<compile_context>
chip_gen: v5e
topology: v5e:2x2
jax: 0.10.0
libtpu: 0.0.40
codegen_flags: <defaults>
</compile_context>

<pallas_src>
import functools

import jax
import jax.numpy as jnp
from jax.experimental import pallas as pl
from jax.experimental.pallas import tpu as pltpu

_LANE = 128
_SUBLANE = 8
_MAX_LANE_W = 1024
_PAD_X = -1.0e4  # sigmoid -> 0, focal -> 0; exp underflows cleanly in f32


def _round_up(x, m):
    return ((x + m - 1) // m) * m


def _hw_config():
    """Per-generation tiling knobs; conservative defaults if introspection fails."""
    max_block_rows, vmem_limit, min_grid = 512, 48 << 20, 1
    try:
        info = pltpu.get_tpu_info()
        vmem = 0
        for name in ("vmem_capacity_bytes", "vmem_size_bytes", "vmem_bytes"):
            v = getattr(info, name, None)
            if v:
                vmem = int(v)
                break
        cores = 1
        for name in ("num_cores", "cores_per_chip", "num_tensorcores",
                     "tensorcores_per_chip"):
            c = getattr(info, name, None)
            if c:
                cores = int(c)
                break
        if vmem >= (100 << 20):
            # 128 MiB VMEM class (v5e / v6e): bigger blocks, higher scoped cap.
            max_block_rows, vmem_limit = 1024, 96 << 20
        elif vmem > 0:
            # 64 MiB VMEM class (v7x): stay at 2 MiB blocks (elementwise-chain
            # VMEM temporaries bound the tile), but use both TensorCores.
            max_block_rows, vmem_limit = 512, 48 << 20
            cores = max(cores, 2)
        min_grid = max(1, min(int(cores), 2))
    except Exception:
        pass
    return max_block_rows, vmem_limit, min_grid


def _choose_lane_w(n):
    """Largest lane width (<=1024, multiple of 128) that divides n exactly."""
    for cand in (_MAX_LANE_W, 512, 256, _LANE):
        if n % cand == 0 and n >= cand * _SUBLANE:
            return cand
    for cand in (_MAX_LANE_W, 512, 256, _LANE):
        if n % cand == 0:
            return cand
    return _LANE


def _choose_block(rows, max_block_rows, min_grid):
    """Pick (block_rows, grid) for a row count."""
    grid = max(min_grid, pl.cdiv(rows, max_block_rows))
    if grid == 1 or rows < 2 * _SUBLANE:
        return rows, 1  # single full block (block == full dim is always legal)
    block_rows = _round_up(pl.cdiv(rows, grid), _SUBLANE)
    grid = pl.cdiv(rows, block_rows)
    return block_rows, grid


def _focal_dice_kernel(x_ref, t_ref, loss_ref, sums_ref, *,
                       gamma, alpha_over_div, valid_rows):
    x = x_ref[...].astype(jnp.float32)
    t = t_ref[...].astype(jnp.float32)

    if valid_rows is not None:
        # Ragged row tail: OOB rows of the last block contain garbage; replace
        # them with inert sentinels (focal -> 0, sigmoid -> 0, t -> 0).
        row_idx = (jax.lax.broadcasted_iota(jnp.int32, x.shape, 0)
                   + pl.program_id(0) * x.shape[0])
        valid = row_idx < valid_rows
        x = jnp.where(valid, x, _PAD_X)
        t = jnp.where(valid, t, 0.0)

    # Shared transcendentals (exp, log1p, exp per element).
    e = jnp.exp(-jnp.abs(x))      # exp(-|x|)
    sp = jnp.log1p(e)             # log(1 + exp(-|x|))

    # Stabilized BCE-with-logits: max(x,0) - x*t + log1p(exp(-|x|))
    bce = jnp.maximum(x, 0.0) - x * t + sp
    # logsigmoid(-x*(2t-1)); for binary targets |-x*(2t-1)| == |x| -> reuse sp.
    z = x - 2.0 * x * t           # == -x*(2t-1)
    invprobs = jnp.minimum(z, 0.0) - sp
    focal = jnp.exp(gamma * invprobs) * bce

    # 1/divider folded into alpha; output kept in f32.
    loss_ref[...] = (alpha_over_div * focal).astype(loss_ref.dtype)

    # sigmoid(x) for the dice sums, reusing e; reciprocal on the EUP slot.
    inv = pl.reciprocal(1.0 + e, approx=True)
    p = jnp.where(x >= 0.0, inv, e * inv)

    # Per-lane partial sums only (sublane reduction on the VPU); the cheap
    # cross-lane / cross-block finish happens in the wrapper.
    lane_pt = jnp.sum(p * t, axis=0, keepdims=True)   # (1, lane_w)
    lane_p = jnp.sum(p, axis=0, keepdims=True)
    lane_t = jnp.sum(t, axis=0, keepdims=True)

    row = jax.lax.broadcasted_iota(jnp.int32, sums_ref.shape, 0)
    sums_ref[...] = jnp.where(
        row == 0, lane_pt,
        jnp.where(row == 1, lane_p, jnp.where(row == 2, lane_t, 0.0)))


def binary_focal_dice(inputs, targets, *, alpha=10.0, gamma=0.75,
                      smooth=1.0, divider=1.0):
    if inputs.shape != targets.shape:
        raise ValueError(
            "Target size ({}) must be the same as input size ({})".format(
                targets.shape, inputs.shape))

    orig_shape = inputs.shape
    out_dtype = inputs.dtype
    n = inputs.size

    max_block_rows, vmem_limit, min_grid = _hw_config()

    padded = False
    if n % _LANE == 0:
        # Fast path: lane width divides n -> pure (free) reshape, no HBM copy.
        lane_w = _choose_lane_w(n)
        rows = n // lane_w
        x2d = inputs.reshape(rows, lane_w)
        t2d = targets.reshape(rows, lane_w)
    else:
        # TODO(synk): lane-ragged element counts (n % 128 != 0) still pad, which
        # copies both inputs once; rare for NCHW tensors.
        padded = True
        lane_w = _LANE
        rows = pl.cdiv(n, lane_w)
        pad = rows * lane_w - n
        x2d = jnp.pad(inputs.reshape(-1), (0, pad),
                      constant_values=_PAD_X).reshape(rows, lane_w)
        t2d = jnp.pad(targets.reshape(-1), (0, pad)).reshape(rows, lane_w)

    block_rows, grid = _choose_block(rows, max_block_rows, min_grid)
    ragged = (grid * block_rows) != rows   # partial last block -> in-kernel mask

    kernel = functools.partial(
        _focal_dice_kernel,
        gamma=float(gamma),
        alpha_over_div=float(alpha) / float(divider),
        valid_rows=(rows if ragged else None))

    focal2d, sums = pl.pallas_call(
        kernel,
        out_shape=(
            jax.ShapeDtypeStruct((rows, lane_w), jnp.float32),
            jax.ShapeDtypeStruct((grid * _SUBLANE, lane_w), jnp.float32),
        ),
        grid_spec=pltpu.PrefetchScalarGridSpec(
            num_scalar_prefetch=0,
            grid=(grid,),
            in_specs=[
                pl.BlockSpec((block_rows, lane_w), lambda i: (i, 0)),
                pl.BlockSpec((block_rows, lane_w), lambda i: (i, 0)),
            ],
            out_specs=[
                pl.BlockSpec((block_rows, lane_w), lambda i: (i, 0)),
                pl.BlockSpec((_SUBLANE, lane_w), lambda i: (i, 0)),
            ],
        ),
        compiler_params=pltpu.CompilerParams(
            dimension_semantics=("parallel",),
            vmem_limit_bytes=vmem_limit,
        ),
    )(x2d, t2d)

    # Tiny scalar glue: finish the dice term from the per-lane partial sums.
    part = sums.reshape(grid, _SUBLANE, lane_w)
    totals = jnp.sum(part[:, :3, :], axis=(0, 2))   # (3,)
    s_int, s_p, s_t = totals[0], totals[1], totals[2]
    dice = -jnp.log((2.0 * s_int + smooth) / (s_p + s_t + smooth))

    # TODO(synk): the scalar-broadcast add of the dice term stays in XLA — it
    # depends on the global sums, so it is necessarily a second (fused) pass.
    out2d = (focal2d + dice * (1.0 / float(divider))).astype(out_dtype)

    if padded:
        return out2d.reshape(-1)[:n].reshape(orig_shape)
    return out2d.reshape(orig_shape)


def _reference(x, t, alpha=10.0, gamma=0.75, smooth=1.0, divider=1.0):
    # Direct transcription of the PyTorch module (BinaryFocalLoss + BinaryLogDice).
    x = x.astype(jnp.float32)
    t = t.astype(jnp.float32)
    max_val = jnp.maximum(-x, 0.0)
    loss = x - x * t + max_val + jnp.log(jnp.exp(-max_val) + jnp.exp(-x - max_val))
    z = -x * (t * 2.0 - 1.0)
    invprobs = jnp.minimum(z, 0.0) - jnp.log1p(jnp.exp(-jnp.abs(z)))  # logsigmoid(z)
    focal = jnp.exp(invprobs * gamma) * loss
    p = jax.nn.sigmoid(x)
    intersection = jnp.sum(p * t)
    dice = -jnp.log((2.0 * intersection + smooth) / (jnp.sum(p) + jnp.sum(t) + smooth))
    return (alpha * focal + dice) / divider


if __name__ == "__main__":
    key = jax.random.PRNGKey(0)
    k_x, k_t = jax.random.split(key)

    shape = (2, 4, 16, 16)  # NCHW logits / binary targets
    x = jax.random.normal(k_x, shape, dtype=jnp.float32)
    t = jax.random.bernoulli(k_t, p=0.5, shape=shape).astype(jnp.float32)

    out = jax.jit(binary_focal_dice)(x, t)
    out = jax.block_until_ready(out)

    ref = _reference(x, t)
    assert out.shape == shape
    max_err = float(jnp.max(jnp.abs(out - ref)))
    # Tolerance covers the EUP approximate reciprocal used for the dice sums
    # (<= ~5e-4 absolute on the dice scalar) plus reduction reassociation.
    assert jnp.allclose(out, ref, atol=2e-3, rtol=1e-3), max_err

    print("KERNEL_OK")
</pallas_src>

<mosaic_0001>
module attributes {stable_mosaic.version = 11 : i64} {
  func.func @_focal_dice_kernel(%arg0: i32, %arg1: memref<8x256xf32, #tpu.memory_space<vmem>>, %arg2: memref<8x256xf32, #tpu.memory_space<vmem>>, %arg3: memref<8x256xf32, #tpu.memory_space<vmem>>, %arg4: memref<8x256xf32, #tpu.memory_space<vmem>>) attributes {dimension_semantics = [#tpu.dimension_semantics<parallel>], iteration_bounds = array<i64: 1>, scalar_prefetch = 0 : i64, scratch_operands = 0 : i64, tpu.core_type = #tpu.core_type<tc>, window_params = [{transform_indices = @transform_0, window_bounds = array<i64: 8, 256>}, {transform_indices = @transform_1, window_bounds = array<i64: 8, 256>}, {transform_indices = @transform_2, window_bounds = array<i64: 8, 256>}, {transform_indices = @transform_3, window_bounds = array<i64: 8, 256>}]} {
    %c0 = arith.constant 0 : index
    %c0_0 = arith.constant 0 : index
    %0 = vector.load %arg1[%c0, %c0_0] : memref<8x256xf32, #tpu.memory_space<vmem>>, vector<8x256xf32>
    %c0_1 = arith.constant 0 : index
    %c0_2 = arith.constant 0 : index
    %1 = vector.load %arg2[%c0_1, %c0_2] : memref<8x256xf32, #tpu.memory_space<vmem>>, vector<8x256xf32>
    %2 = math.absf %0 : vector<8x256xf32>
    %cst = arith.constant 0.000000e+00 : f32
    %3 = vector.broadcast %cst : f32 to vector<8x256xf32>
    %4 = arith.subf %3, %2 : vector<8x256xf32>
    %5 = math.exp %4 : vector<8x256xf32>
    %6 = math.log1p %5 : vector<8x256xf32>
    %cst_3 = arith.constant 0.000000e+00 : f32
    %7 = vector.broadcast %cst_3 : f32 to vector<8x256xf32>
    %8 = arith.maximumf %0, %7 : vector<8x256xf32>
    %9 = arith.mulf %0, %1 : vector<8x256xf32>
    %10 = arith.subf %8, %9 : vector<8x256xf32>
    %11 = arith.addf %10, %6 : vector<8x256xf32>
    %cst_4 = arith.constant 2.000000e+00 : f32
    %12 = vector.broadcast %cst_4 : f32 to vector<8x256xf32>
    %13 = arith.mulf %12, %0 : vector<8x256xf32>
    %14 = arith.mulf %13, %1 : vector<8x256xf32>
    %15 = arith.subf %0, %14 : vector<8x256xf32>
    %cst_5 = arith.constant 0.000000e+00 : f32
    %16 = vector.broadcast %cst_5 : f32 to vector<8x256xf32>
    %17 = arith.minimumf %15, %16 : vector<8x256xf32>
    %18 = arith.subf %17, %6 : vector<8x256xf32>
    %cst_6 = arith.constant 7.500000e-01 : f32
    %19 = vector.broadcast %cst_6 : f32 to vector<8x256xf32>
    %20 = arith.mulf %19, %18 : vector<8x256xf32>
    %21 = math.exp %20 : vector<8x256xf32>
    %22 = arith.mulf %21, %11 : vector<8x256xf32>
    %cst_7 = arith.constant 1.000000e+01 : f32
    %23 = vector.broadcast %cst_7 : f32 to vector<8x256xf32>
    %24 = arith.mulf %23, %22 : vector<8x256xf32>
    %c0_8 = arith.constant 0 : index
    %c0_9 = arith.constant 0 : index
    %25 = vector.load %arg3[%c0_8, %c0_9] : memref<8x256xf32, #tpu.memory_space<vmem>>, vector<8x256xf32>
    tpu.vector_store %arg3[%c0_8, %c0_9], %24 {strides = array<i32>} : memref<8x256xf32, #tpu.memory_space<vmem>>, vector<8x256xf32>,
    %cst_10 = arith.constant 1.000000e+00 : f32
    %26 = vector.broadcast %cst_10 : f32 to vector<8x256xf32>
    %27 = arith.addf %26, %5 : vector<8x256xf32>
    %28 = tpu.reciprocal %27 {approx = true} : vector<8x256xf32> -> vector<8x256xf32>
    %cst_11 = arith.constant 0.000000e+00 : f32
    %29 = vector.broadcast %cst_11 : f32 to vector<8x256xf32>
    %30 = arith.cmpf oge, %0, %29 : vector<8x256xf32>
    %31 = arith.mulf %5, %28 : vector<8x256xf32>
    %32 = arith.select %30, %28, %31 : vector<8x256xi1>, vector<8x256xf32>
    %33 = arith.mulf %32, %1 : vector<8x256xf32>
    %cst_12 = arith.constant dense<0.000000e+00> : vector<256xf32>
    %34 = vector.multi_reduction <add>, %33, %cst_12 [0] : vector<8x256xf32> to vector<256xf32>
    %35 = vector.shape_cast %34 : vector<256xf32> to vector<1x256xf32>
    %cst_13 = arith.constant dense<0.000000e+00> : vector<256xf32>
    %36 = vector.multi_reduction <add>, %32, %cst_13 [0] : vector<8x256xf32> to vector<256xf32>
    %37 = vector.shape_cast %36 : vector<256xf32> to vector<1x256xf32>
    %cst_14 = arith.constant dense<0.000000e+00> : vector<256xf32>
    %38 = vector.multi_reduction <add>, %1, %cst_14 [0] : vector<8x256xf32> to vector<256xf32>
    %39 = vector.shape_cast %38 : vector<256xf32> to vector<1x256xf32>
    %40 = tpu.iota {dimensions = array<i32: 0>} : vector<8x256xi32>
    %c0_i32 = arith.constant 0 : i32
    %41 = vector.broadcast %c0_i32 : i32 to vector<8x256xi32>
    %42 = arith.cmpi eq, %40, %41 : vector<8x256xi32>
    %c1_i32 = arith.constant 1 : i32
    %43 = vector.broadcast %c1_i32 : i32 to vector<8x256xi32>
    %44 = arith.cmpi eq, %40, %43 : vector<8x256xi32>
    %c2_i32 = arith.constant 2 : i32
    %45 = vector.broadcast %c2_i32 : i32 to vector<8x256xi32>
    %46 = arith.cmpi eq, %40, %45 : vector<8x256xi32>
    %cst_15 = arith.constant 0.000000e+00 : f32
    %47 = vector.shape_cast %39 : vector<1x256xf32> to vector<1x256xf32>
    %48 = vector.broadcast %47 : vector<1x256xf32> to vector<8x256xf32>
    %49 = vector.broadcast %cst_15 : f32 to vector<8x256xf32>
    %50 = arith.select %46, %48, %49 : vector<8x256xi1>, vector<8x256xf32>
    %51 = vector.shape_cast %37 : vector<1x256xf32> to vector<1x256xf32>
    %52 = vector.broadcast %51 : vector<1x256xf32> to vector<8x256xf32>
    %53 = arith.select %44, %52, %50 : vector<8x256xi1>, vector<8x256xf32>
    %54 = vector.shape_cast %35 : vector<1x256xf32> to vector<1x256xf32>
    %55 = vector.broadcast %54 : vector<1x256xf32> to vector<8x256xf32>
    %56 = arith.select %42, %55, %53 : vector<8x256xi1>, vector<8x256xf32>
    %c0_16 = arith.constant 0 : index
    %c0_17 = arith.constant 0 : index
    %57 = vector.load %arg4[%c0_16, %c0_17] : memref<8x256xf32, #tpu.memory_space<vmem>>, vector<8x256xf32>
    tpu.vector_store %arg4[%c0_16, %c0_17], %56 {strides = array<i32>} : memref<8x256xf32, #tpu.memory_space<vmem>>, vector<8x256xf32>,
    return
  }
  func.func @transform_0(%arg0: i32) -> (i32, i32) {
    %c0_i32 = arith.constant 0 : i32
    %c0_i32_0 = arith.constant 0 : i32
    return %arg0, %c0_i32 : i32, i32
  }
  func.func @transform_1(%arg0: i32) -> (i32, i32) {
    %c0_i32 = arith.constant 0 : i32
    %c0_i32_0 = arith.constant 0 : i32
    return %arg0, %c0_i32 : i32, i32
  }
  func.func @transform_2(%arg0: i32) -> (i32, i32) {
    %c0_i32 = arith.constant 0 : i32
    %c0_i32_0 = arith.constant 0 : i32
    return %arg0, %c0_i32 : i32, i32
  }
  func.func @transform_3(%arg0: i32) -> (i32, i32) {
    %c0_i32 = arith.constant 0 : i32
    %c0_i32_0 = arith.constant 0 : i32
    return %arg0, %c0_i32 : i32, i32
  }
}

</mosaic_0001>

<bundles_post_ra>
// kernel: binary_focal_dice.1
= control target key start
LH: loop header
LB: loop body
LE: loop exit
PB: predicated region body
PF: predicated region fallthrough
CT: control target
= control target key end

     0   :  { %v121_v42 = vlaneseq  ;;  %s226_s0 = inlined_call_operand.vmem [shape: f32[8,256], index: 0, kind: input, shape index: {}]   ;;  %s227_s1 = inlined_call_operand.vmem [shape: f32[8,256], index: 1, kind: input, shape index: {}]   ;;  %s228_s3 = inlined_call_operand.vmem [shape: f32[8,256], index: 3, kind: output, shape index: {1}]   ;;  %s229_s2 = inlined_call_operand.vmem [shape: f32[8,256], index: 2, kind: output, shape index: {0}]  }
   0x1   :  { %v181_v0 = vld [vmem:[%s226_s0] sm:$0xff]  ;;  %v186_v1 = vld [vmem:[%s226_s0 + $0x8] sm:$0xff] }
   0x2   :  { %v17_v2 = vand.u32 2147483647, %v181_v0  ;;  %v18_v3 = vand.u32 2147483647, %v186_v1  ;;  %v51_v8 = vmul.f32 2.0, %v181_v0  ;;  %v15_v9 = vld [vmem:[%s227_s1] sm:$0xff] }
   0x3   :  { %v52_v10 = vmul.f32 2.0, %v186_v1  ;;  %v109_v11 = vrot.slane %v15_v9, 4  ;;  %v16_v13 = vld [vmem:[%s227_s1 + $0x8] sm:$0xff]  ;;  %v43_v24 = vmax.f32 %v181_v0, 0.0  ;;  %v45_v25 = vmul.f32 %v15_v9, %v181_v0 }
   0x4   :  { %v19_v4 = vsub.f32 0.0, %v17_v2  ;;  %v20_v5 = vsub.f32 0.0, %v18_v3  ;;  %v53_v17 = vmul.f32 %v51_v8, %v15_v9  ;;  %v115_v18 = vrot.slane %v16_v13, 4 }
   0x5   :  { %v54_v21 = vmul.f32 %v52_v10, %v16_v13  ;;  %v110_v22 = vadd.f32 %v109_v11, %v15_v9  ;;  %vm77_vm0 = vcmp.ge.f32.partialorder %v181_v0, 0.0  ;;  %v47_v35 = vsub.f32 %v43_v24, %v45_v25 }
   0x6   :  { %v21_v6 = vmul.f32 1.442695, %v19_v4  ;;  %v23_v7 = vmul.f32 1.442695, %v20_v5  ;;  %v55_v27 = vsub.f32 %v181_v0, %v53_v17  ;;  %v116_v28 = vadd.f32 %v115_v18, %v16_v13 }
   0x7   :  { %v56_v31 = vsub.f32 %v186_v1, %v54_v21  ;;  %v111_v32 = vrot.slane %v110_v22, 2  ;;  %v44_v41 = vmax.f32 %v186_v1, 0.0  ;;  %v46_v50 = vmul.f32 %v16_v13, %v186_v1 }
   0x8   :  { %142 = vpow2.f32 %v21_v6  ;;  %v57_v36 = vmin.f32 %v55_v27, 0.0  ;;  %v117_v37 = vrot.slane %v116_v28, 2  ;;  %vm78_vm3 = vcmp.ge.f32.partialorder %v186_v1, 0.0 }
   0x9   :  { %144 = vpow2.f32 %v23_v7  ;;  %v58_v44 = vmin.f32 %v56_v31, 0.0  ;;  %v112_v46 = vadd.f32 %v111_v32, %v110_v22  ;;  %v122_v58 = vshrl.u32 %v121_v42, 7 }
   0xa   :  { %v118_v54 = vadd.f32 %v117_v37, %v116_v28  ;;  %v48_v1 = vsub.f32 %v44_v41, %v46_v50 }
   0xb   :  { %v113_v61 = vrot.slane %v112_v46, 1  ;;  %vm125_vm4 = vcmp.eq.s32.totalorder %v122_v58, 2  ;;  %vm124_vm5 = vcmp.eq.s32.totalorder %v122_v58, 1  ;;  %vm123_vm6 = vcmp.eq.s32.totalorder %v122_v58, 0 }
   0xc   :  { %v119_v7 = vrot.slane %v118_v54, 1 }
   0xe   :  { %v143_v12 = vpop.eup %142 }
   0xf   :  { %v145_v14 = vpop.eup %144  ;;  %v25_v15 = vadd.f32 1.0, %v143_v12  ;;  %v28_v16 = vmul.f32 -0.5, %v143_v12  ;;  %v31_v26 = vand.u32 2147483647, %v143_v12 }
  0x10   :  { %v34_v19 = vadd.f32 1.0, %v145_v14  ;;  %v37_v20 = vmul.f32 -0.5, %v145_v14  ;;  %v40_v30 = vand.u32 2147483647, %v145_v14 }
  0x11   :  { %146 = vlog2.f32 %v25_v15  ;;  %v29_v23 = vadd.f32 1.0, %v28_v16  ;;  %vm32_vm1 = vcmp.lt.f32.partialorder %v31_v26, 0.0004427343 }
  0x12   :  { %148 = vrcp.f32 %v25_v15  ;;  %v38_v29 = vadd.f32 1.0, %v37_v20  ;;  %vm41_vm2 = vcmp.lt.f32.partialorder %v40_v30, 0.0004427343 }
  0x13   :  { %150 = vlog2.f32 %v34_v19  ;;  %v30_v33 = vmul.f32 %v143_v12, %v29_v23 }
  0x14   :  { %152 = vrcp.f32 %v34_v19  ;;  %v39_v40 = vmul.f32 %v145_v14, %v38_v29 }
  0x17   :  { %v147_v34 = vpop.eup %146 }
  0x18   :  { %v149_v38 = vpop.eup %148  ;;  %v27_v39 = vmul.f32 0.6931472, %v147_v34 }
  0x19   :  { %v151_v43 = vpop.eup %150  ;;  %v79_v45 = vmul.f32 %v149_v38, %v143_v12  ;;  %v114_v12 = vadd.f32 %v113_v61, %v112_v46 }
  0x1a   :  { %v153_v47 = vpop.eup %152  ;;  %v33_v48 = vsel %vm32_vm1, %v30_v33, %v27_v39  ;;  %v36_v49 = vmul.f32 0.6931472, %v151_v43 }
  0x1b   :  { %v59_v51 = vsub.f32 %v57_v36, %v33_v48  ;;  %v81_v52 = vsel %vm77_vm0, %v149_v38, %v79_v45  ;;  %v80_v53 = vmul.f32 %v153_v47, %v145_v14  ;;  %v49_v18 = vadd.f32 %v47_v35, %v33_v48 }
  0x1c   :  { %v42_v55 = vsel %vm41_vm2, %v39_v40, %v36_v49  ;;  %v83_v56 = vmul.f32 %v81_v52, %v15_v9  ;;  %v97_v57 = vrot.slane %v81_v52, 4  ;;  %v126_v24 = vsel %vm125_vm4, %v114_v12, 0.0 }
  0x1d   :  { %v61_v59 = vmul.f32 0.75, %v59_v51  ;;  %v60_v60 = vsub.f32 %v58_v44, %v42_v55  ;;  %v82_v62 = vsel %vm78_vm3, %v153_v47, %v80_v53  ;;  %v50_v23 = vadd.f32 %v48_v1, %v42_v55 }
  0x1e   :  { %v85_v63 = vrot.slane %v83_v56, 4  ;;  %v98_v2 = vadd.f32 %v97_v57, %v81_v52  ;;  %v84_v3 = vmul.f32 %v82_v62, %v16_v13  ;;  %v103_v4 = vrot.slane %v82_v62, 4 }
  0x1f   :  { %v63_v5 = vmul.f32 1.442695, %v61_v59  ;;  %v62_v6 = vmul.f32 0.75, %v60_v60  ;;  %v120_v13 = vadd.f32 %v119_v7, %v118_v54 }
  0x20   :  { %v86_v0 = vadd.f32 %v85_v63, %v83_v56  ;;  %v99_v8 = vrot.slane %v98_v2, 2  ;;  %v91_v10 = vrot.slane %v84_v3, 4  ;;  %v104_v11 = vadd.f32 %v103_v4, %v82_v62 }
  0x21   :  { %154 = vpow2.f32 %v63_v5  ;;  %v65_v9 = vmul.f32 1.442695, %v62_v6  ;;  %v127_v30 = vsel %vm125_vm4, %v120_v13, 0.0 }
  0x22   :  { %v87_v14 = vrot.slane %v86_v0, 2  ;;  %v100_v15 = vadd.f32 %v99_v8, %v98_v2  ;;  %v92_v16 = vadd.f32 %v91_v10, %v84_v3  ;;  %v105_v17 = vrot.slane %v104_v11, 2 }
  0x23   :  { %156 = vpow2.f32 %v65_v9 }
  0x24   :  { %v88_v19 = vadd.f32 %v87_v14, %v86_v0  ;;  %v101_v20 = vrot.slane %v100_v15, 1  ;;  %v93_v21 = vrot.slane %v92_v16, 2  ;;  %v106_v22 = vadd.f32 %v105_v17, %v104_v11 }
  0x26   :  { %v89_v25 = vrot.slane %v88_v19, 1  ;;  %v102_v26 = vadd.f32 %v101_v20, %v100_v15  ;;  %v94_v27 = vadd.f32 %v93_v21, %v92_v16  ;;  %v107_v28 = vrot.slane %v106_v22, 1 }
  0x27   :  { %v155_v29 = vpop.eup %154 }
  0x28   :  { %v67_v31 = vmul.f32 %v155_v29, %v49_v18  ;;  %v90_v32 = vadd.f32 %v89_v25, %v88_v19  ;;  %v128_v33 = vsel %vm124_vm5, %v102_v26, %v126_v24  ;;  %v95_v34 = vrot.slane %v94_v27, 1 }
  0x29   :  { %v157_v35 = vpop.eup %156  ;;  %v108_v36 = vadd.f32 %v107_v28, %v106_v22 }
  0x2a   :  { %v69_v37 = vmul.f32 10.0, %v67_v31  ;;  %v68_v38 = vmul.f32 %v157_v35, %v50_v23  ;;  %v130_v39 = vsel %vm123_vm6, %v90_v32, %v128_v33  ;;  %v96_v40 = vadd.f32 %v95_v34, %v94_v27 }
  0x2b   :  { %132 = vst [vmem:[%s228_s3] sm:$0xff] %v130_v39  ;;  %v129_v41 = vsel %vm124_vm5, %v108_v36, %v127_v30 }
  0x2c   :  { %71 = vst [vmem:[%s229_s2] sm:$0xff] %v69_v37  ;;  %v70_v42 = vmul.f32 10.0, %v68_v38  ;;  %v131_v43 = vsel %vm123_vm6, %v96_v40, %v129_v41 }
  0x2d   :  { %133 = vst [vmem:[%s228_s3 + $0x8] sm:$0xff] %v131_v43 }
  0x2e   :  { %72 = vst [vmem:[%s229_s2 + $0x8] sm:$0xff] %v70_v42 }

</bundles_post_ra>
